<compile_context>
chip_gen: v5e
topology: v5e:2x2
jax: 0.10.0
libtpu: 0.0.40
codegen_flags: <defaults>
</compile_context>

<pallas_src>
import jax
import jax.numpy as jnp
from jax import lax
from jax.experimental import pallas as pl
from jax.experimental.pallas import tpu as pltpu


def _round_up(x, m):
    return ((x + m - 1) // m) * m


def _packed_lookup_kernel(tok_ref, table_ref, out_ref):
    # tok_ref:   (TR, PACK) int32  -- PACK token ids per packed output row
    # table_ref: (PACK, Vp, 128) f32 -- table[j, v, j*2C + c] = [logits|probs][v, c]
    #                                   (zeros elsewhere, zeros for v >= vocab)
    # out_ref:   (TR, 128) f32 -- lane-dense packed [logits|probs] rows
    tr, pack = tok_ref.shape
    vp = table_ref.shape[1]

    tok = tok_ref[...]                                         # (TR, PACK) int32
    iota_v = lax.broadcasted_iota(jnp.int32, (tr, vp), 1)      # vocab-lane index

    out = None
    for j in range(pack):  # static unroll (PACK <= 8)
        # exact row gather of table[j] via one-hot @ table on the MXU
        onehot = (iota_v == tok[:, j:j + 1]).astype(jnp.float32)       # (TR, Vp)
        contrib = jnp.dot(onehot, table_ref[j],
                          preferred_element_type=jnp.float32)          # (TR, 128)
        out = contrib if out is None else out + contrib                # disjoint lanes
    out_ref[...] = out                                                  # unmasked full vst


def packed_lookup_pallas(tokens_flat, table, *, tile_rows=512):
    """tokens_flat: (R,) int.  table: (PACK, Vp, 128) f32.

    Returns (packed, rows_pad) where packed is (rows_pad, 128) f32 with PACK
    tokens' [logits|probs] packed per row.
    """
    R = tokens_flat.shape[0]
    pack, vp, lanes = table.shape
    assert lanes == 128

    rows = pl.cdiv(R, pack)
    if rows > tile_rows:
        tr = tile_rows
    elif rows >= 64:
        # keep >= 2 grid steps so v7x's two TensorCores both get work
        tr = _round_up(pl.cdiv(rows, 2), 8)
    else:
        tr = max(8, _round_up(rows, 8))
    rows_pad = _round_up(rows, tr)

    total = rows_pad * pack
    tok = tokens_flat.astype(jnp.int32)
    if total != R:
        tok = jnp.pad(tok, (0, total - R))     # padded slots use token 0; sliced off later
    tok = tok.reshape(rows_pad, pack)

    packed = pl.pallas_call(
        _packed_lookup_kernel,
        out_shape=jax.ShapeDtypeStruct((rows_pad, 128), jnp.float32),
        grid_spec=pltpu.PrefetchScalarGridSpec(
            num_scalar_prefetch=0,
            grid=(rows_pad // tr,),
            in_specs=[
                pl.BlockSpec((tr, pack), lambda i: (i, 0)),       # token ids (row tile)
                pl.BlockSpec((pack, vp, 128), lambda i: (0, 0, 0)),  # fused table (invariant)
            ],
            out_specs=pl.BlockSpec((tr, 128), lambda i: (i, 0)),
        ),
        compiler_params=pltpu.CompilerParams(
            dimension_semantics=("parallel",),
        ),
    )(tok, table)
    return packed, rows_pad


class PallasLithologyModel:
    """Concrete realization of the abstract `Model.forward` (inference path)."""

    def __init__(self, vocab_size=16, hidden=32, num_classes=8, seed=0):
        self.vocab_size = vocab_size
        self.hidden = hidden
        self.num_classes = num_classes

        k = jax.random.PRNGKey(seed)
        k_emb, k_w1, k_w2 = jax.random.split(k, 3)
        scale = 0.1
        self.embedding = scale * jax.random.normal(k_emb, (vocab_size, hidden), jnp.float32)
        self.w1 = scale * jax.random.normal(k_w1, (hidden, hidden), jnp.float32)
        self.b1 = jnp.zeros((1, hidden), jnp.float32)
        self.w2 = scale * jax.random.normal(k_w2, (hidden, num_classes), jnp.float32)
        self.b2 = jnp.zeros((1, num_classes), jnp.float32)

        # ---- fold the whole head into a per-token [logits | probs] table ----
        C = num_classes
        c2 = 2 * C
        self.pack = 128 // c2 if (128 % c2 == 0) else 1      # tokens per packed output row
        self.lane_per_tok = 128 // self.pack                 # == 2C when packing divides 128

        Vp = _round_up(vocab_size, 128)                      # lane-dense one-hot K dim
        pre = self.embedding @ self.w1 + self.b1             # (V, H)
        L = jnp.maximum(pre, 0.0) @ self.w2 + self.b2        # (V, C) exact logits per token id
        P = jax.nn.softmax(L, axis=-1)                       # (V, C) exact probs per token id
        row_table = jnp.concatenate([L, P], axis=-1)         # (V, 2C)

        # Block-shifted table: slot j's copy lives at lane offset j*2C so the
        # kernel's per-slot matmul results land in disjoint lanes (packed output
        # without any in-kernel relayout).  Rows v >= vocab_size stay zero.
        table = jnp.zeros((self.pack, Vp, 128), jnp.float32)
        for j in range(self.pack):
            table = table.at[j, :vocab_size, j * c2:(j + 1) * c2].set(row_table)
        self._table = table
        # NOTE: token ids outside [0, vocab_size) gather all-zero table rows
        # (zero logits / zero probs) instead of raising; valid inputs only.

    def forward(self, tokens):
        """tokens: int32 (B, S). Returns (output_logits, probs), each (B, S, C)."""
        B, S = tokens.shape
        C = self.num_classes
        R = B * S
        packed, rows_pad = packed_lookup_pallas(tokens.reshape(-1), self._table)
        # Free contiguous un-pack of the lane-dense slab, then compact slices.
        flat = packed.reshape(rows_pad * self.pack, self.lane_per_tok)[:R]
        logits = flat[:, :C].reshape(B, S, C)
        probs = flat[:, C:2 * C].reshape(B, S, C)
        return logits, probs

    # pure-JAX reference of the same forward (for verification only)
    def forward_reference(self, tokens):
        B, S = tokens.shape
        x = jnp.take(self.embedding, tokens.reshape(-1), axis=0)          # (B*S, H)
        h = jnp.maximum(x @ self.w1 + self.b1, 0.0)
        logits = h @ self.w2 + self.b2
        probs = jax.nn.softmax(logits, axis=-1)
        C = self.num_classes
        return logits.reshape(B, S, C), probs.reshape(B, S, C)


# TODO(synk): training loop / Dataset / DataLoader / CrossEntropyLoss / Adam from
# the spec are host-side pipeline code with no Pallas equivalent; only the
# forward pass is implemented.

if __name__ == "__main__":
    # Small deterministic inputs: batch=2, seq=8, vocab=16, hidden=32, classes=8
    key = jax.random.PRNGKey(0)
    B, S = 2, 8
    model = PallasLithologyModel(vocab_size=16, hidden=32, num_classes=8, seed=0)
    tokens = jax.random.randint(key, (B, S), 0, model.vocab_size, dtype=jnp.int32)

    logits, probs = model.forward(tokens)
    jax.block_until_ready((logits, probs))

    # sanity: shapes, probs rows sum to 1, and match the pure-JAX reference
    assert logits.shape == (B, S, model.num_classes)
    assert probs.shape == (B, S, model.num_classes)
    row_sums = jnp.sum(probs, axis=-1)
    assert jnp.allclose(row_sums, 1.0, atol=1e-3), row_sums

    ref_logits, ref_probs = model.forward_reference(tokens)
    assert jnp.allclose(logits, ref_logits, atol=1e-3, rtol=1e-3)
    assert jnp.allclose(probs, ref_probs, atol=1e-3, rtol=1e-3)

    print("KERNEL_OK")
</pallas_src>

<mosaic_0001>
module attributes {stable_mosaic.version = 11 : i64} {
  func.func @_packed_lookup_kernel(%arg0: i32, %arg1: memref<8x8xi32, #tpu.memory_space<vmem>>, %arg2: memref<8x128x128xf32, #tpu.memory_space<vmem>>, %arg3: memref<8x128xf32, #tpu.memory_space<vmem>>) attributes {dimension_semantics = [#tpu.dimension_semantics<parallel>], iteration_bounds = array<i64: 1>, scalar_prefetch = 0 : i64, scratch_operands = 0 : i64, tpu.core_type = #tpu.core_type<tc>, window_params = [{transform_indices = @transform_0, window_bounds = array<i64: 8, 8>}, {pipeline_mode = #tpu.pipeline_mode<synchronous>, transform_indices = @transform_1, window_bounds = array<i64: 8, 128, 128>}, {transform_indices = @transform_2, window_bounds = array<i64: 8, 128>}]} {
    %c0 = arith.constant 0 : index
    %c0_0 = arith.constant 0 : index
    %0 = vector.load %arg1[%c0, %c0_0] : memref<8x8xi32, #tpu.memory_space<vmem>>, vector<8x8xi32>
    %1 = tpu.iota {dimensions = array<i32: 1>} : vector<8x128xi32>
    %2 = vector.extract_strided_slice %0 {offsets = [0, 0], sizes = [8, 1], strides = [1, 1]} : vector<8x8xi32> to vector<8x1xi32>
    %3 = vector.broadcast %2 : vector<8x1xi32> to vector<8x128xi32>
    %4 = arith.cmpi eq, %1, %3 : vector<8x128xi32>
    %5 = arith.extui %4 : vector<8x128xi1> to vector<8x128xi32>
    %6 = arith.sitofp %5 : vector<8x128xi32> to vector<8x128xf32>
    %c0_1 = arith.constant 0 : index
    %c0_2 = arith.constant 0 : index
    %c0_3 = arith.constant 0 : index
    %7 = vector.load %arg2[%c0_1, %c0_2, %c0_3] : memref<8x128x128xf32, #tpu.memory_space<vmem>>, vector<1x128x128xf32>
    %8 = vector.shape_cast %7 : vector<1x128x128xf32> to vector<128x128xf32>
    %cst = arith.constant dense<0.000000e+00> : vector<8x128xf32>
    %9 = tpu.matmul %6, %8, %cst {dimension_numbers = #tpu.dot_dimension_numbers<[1], [0], [0], [1], [0, 0, 1, 1], [], []>} : vector<8x128xf32>, vector<128x128xf32>, vector<8x128xf32> -> vector<8x128xf32>
    %10 = vector.extract_strided_slice %0 {offsets = [0, 1], sizes = [8, 1], strides = [1, 1]} : vector<8x8xi32> to vector<8x1xi32>
    %11 = vector.broadcast %10 : vector<8x1xi32> to vector<8x128xi32>
    %12 = arith.cmpi eq, %1, %11 : vector<8x128xi32>
    %13 = arith.extui %12 : vector<8x128xi1> to vector<8x128xi32>
    %14 = arith.sitofp %13 : vector<8x128xi32> to vector<8x128xf32>
    %c1 = arith.constant 1 : index
    %c0_4 = arith.constant 0 : index
    %c0_5 = arith.constant 0 : index
    %15 = vector.load %arg2[%c1, %c0_4, %c0_5] : memref<8x128x128xf32, #tpu.memory_space<vmem>>, vector<1x128x128xf32>
    %16 = vector.shape_cast %15 : vector<1x128x128xf32> to vector<128x128xf32>
    %cst_6 = arith.constant dense<0.000000e+00> : vector<8x128xf32>
    %17 = tpu.matmul %14, %16, %cst_6 {dimension_numbers = #tpu.dot_dimension_numbers<[1], [0], [0], [1], [0, 0, 1, 1], [], []>} : vector<8x128xf32>, vector<128x128xf32>, vector<8x128xf32> -> vector<8x128xf32>
    %18 = arith.addf %9, %17 : vector<8x128xf32>
    %19 = vector.extract_strided_slice %0 {offsets = [0, 2], sizes = [8, 1], strides = [1, 1]} : vector<8x8xi32> to vector<8x1xi32>
    %20 = vector.broadcast %19 : vector<8x1xi32> to vector<8x128xi32>
    %21 = arith.cmpi eq, %1, %20 : vector<8x128xi32>
    %22 = arith.extui %21 : vector<8x128xi1> to vector<8x128xi32>
    %23 = arith.sitofp %22 : vector<8x128xi32> to vector<8x128xf32>
    %c2 = arith.constant 2 : index
    %c0_7 = arith.constant 0 : index
    %c0_8 = arith.constant 0 : index
    %24 = vector.load %arg2[%c2, %c0_7, %c0_8] : memref<8x128x128xf32, #tpu.memory_space<vmem>>, vector<1x128x128xf32>
    %25 = vector.shape_cast %24 : vector<1x128x128xf32> to vector<128x128xf32>
    %cst_9 = arith.constant dense<0.000000e+00> : vector<8x128xf32>
    %26 = tpu.matmul %23, %25, %cst_9 {dimension_numbers = #tpu.dot_dimension_numbers<[1], [0], [0], [1], [0, 0, 1, 1], [], []>} : vector<8x128xf32>, vector<128x128xf32>, vector<8x128xf32> -> vector<8x128xf32>
    %27 = arith.addf %18, %26 : vector<8x128xf32>
    %28 = vector.extract_strided_slice %0 {offsets = [0, 3], sizes = [8, 1], strides = [1, 1]} : vector<8x8xi32> to vector<8x1xi32>
    %29 = vector.broadcast %28 : vector<8x1xi32> to vector<8x128xi32>
    %30 = arith.cmpi eq, %1, %29 : vector<8x128xi32>
    %31 = arith.extui %30 : vector<8x128xi1> to vector<8x128xi32>
    %32 = arith.sitofp %31 : vector<8x128xi32> to vector<8x128xf32>
    %c3 = arith.constant 3 : index
    %c0_10 = arith.constant 0 : index
    %c0_11 = arith.constant 0 : index
    %33 = vector.load %arg2[%c3, %c0_10, %c0_11] : memref<8x128x128xf32, #tpu.memory_space<vmem>>, vector<1x128x128xf32>
    %34 = vector.shape_cast %33 : vector<1x128x128xf32> to vector<128x128xf32>
    %cst_12 = arith.constant dense<0.000000e+00> : vector<8x128xf32>
    %35 = tpu.matmul %32, %34, %cst_12 {dimension_numbers = #tpu.dot_dimension_numbers<[1], [0], [0], [1], [0, 0, 1, 1], [], []>} : vector<8x128xf32>, vector<128x128xf32>, vector<8x128xf32> -> vector<8x128xf32>
    %36 = arith.addf %27, %35 : vector<8x128xf32>
    %37 = vector.extract_strided_slice %0 {offsets = [0, 4], sizes = [8, 1], strides = [1, 1]} : vector<8x8xi32> to vector<8x1xi32>
    %38 = vector.broadcast %37 : vector<8x1xi32> to vector<8x128xi32>
    %39 = arith.cmpi eq, %1, %38 : vector<8x128xi32>
    %40 = arith.extui %39 : vector<8x128xi1> to vector<8x128xi32>
    %41 = arith.sitofp %40 : vector<8x128xi32> to vector<8x128xf32>
    %c4 = arith.constant 4 : index
    %c0_13 = arith.constant 0 : index
    %c0_14 = arith.constant 0 : index
    %42 = vector.load %arg2[%c4, %c0_13, %c0_14] : memref<8x128x128xf32, #tpu.memory_space<vmem>>, vector<1x128x128xf32>
    %43 = vector.shape_cast %42 : vector<1x128x128xf32> to vector<128x128xf32>
    %cst_15 = arith.constant dense<0.000000e+00> : vector<8x128xf32>
    %44 = tpu.matmul %41, %43, %cst_15 {dimension_numbers = #tpu.dot_dimension_numbers<[1], [0], [0], [1], [0, 0, 1, 1], [], []>} : vector<8x128xf32>, vector<128x128xf32>, vector<8x128xf32> -> vector<8x128xf32>
    %45 = arith.addf %36, %44 : vector<8x128xf32>
    %46 = vector.extract_strided_slice %0 {offsets = [0, 5], sizes = [8, 1], strides = [1, 1]} : vector<8x8xi32> to vector<8x1xi32>
    %47 = vector.broadcast %46 : vector<8x1xi32> to vector<8x128xi32>
    %48 = arith.cmpi eq, %1, %47 : vector<8x128xi32>
    %49 = arith.extui %48 : vector<8x128xi1> to vector<8x128xi32>
    %50 = arith.sitofp %49 : vector<8x128xi32> to vector<8x128xf32>
    %c5 = arith.constant 5 : index
    %c0_16 = arith.constant 0 : index
    %c0_17 = arith.constant 0 : index
    %51 = vector.load %arg2[%c5, %c0_16, %c0_17] : memref<8x128x128xf32, #tpu.memory_space<vmem>>, vector<1x128x128xf32>
    %52 = vector.shape_cast %51 : vector<1x128x128xf32> to vector<128x128xf32>
    %cst_18 = arith.constant dense<0.000000e+00> : vector<8x128xf32>
    %53 = tpu.matmul %50, %52, %cst_18 {dimension_numbers = #tpu.dot_dimension_numbers<[1], [0], [0], [1], [0, 0, 1, 1], [], []>} : vector<8x128xf32>, vector<128x128xf32>, vector<8x128xf32> -> vector<8x128xf32>
    %54 = arith.addf %45, %53 : vector<8x128xf32>
    %55 = vector.extract_strided_slice %0 {offsets = [0, 6], sizes = [8, 1], strides = [1, 1]} : vector<8x8xi32> to vector<8x1xi32>
    %56 = vector.broadcast %55 : vector<8x1xi32> to vector<8x128xi32>
    %57 = arith.cmpi eq, %1, %56 : vector<8x128xi32>
    %58 = arith.extui %57 : vector<8x128xi1> to vector<8x128xi32>
    %59 = arith.sitofp %58 : vector<8x128xi32> to vector<8x128xf32>
    %c6 = arith.constant 6 : index
    %c0_19 = arith.constant 0 : index
    %c0_20 = arith.constant 0 : index
    %60 = vector.load %arg2[%c6, %c0_19, %c0_20] : memref<8x128x128xf32, #tpu.memory_space<vmem>>, vector<1x128x128xf32>
    %61 = vector.shape_cast %60 : vector<1x128x128xf32> to vector<128x128xf32>
    %cst_21 = arith.constant dense<0.000000e+00> : vector<8x128xf32>
    %62 = tpu.matmul %59, %61, %cst_21 {dimension_numbers = #tpu.dot_dimension_numbers<[1], [0], [0], [1], [0, 0, 1, 1], [], []>} : vector<8x128xf32>, vector<128x128xf32>, vector<8x128xf32> -> vector<8x128xf32>
    %63 = arith.addf %54, %62 : vector<8x128xf32>
    %64 = vector.extract_strided_slice %0 {offsets = [0, 7], sizes = [8, 1], strides = [1, 1]} : vector<8x8xi32> to vector<8x1xi32>
    %65 = vector.broadcast %64 : vector<8x1xi32> to vector<8x128xi32>
    %66 = arith.cmpi eq, %1, %65 : vector<8x128xi32>
    %67 = arith.extui %66 : vector<8x128xi1> to vector<8x128xi32>
    %68 = arith.sitofp %67 : vector<8x128xi32> to vector<8x128xf32>
    %c7 = arith.constant 7 : index
    %c0_22 = arith.constant 0 : index
    %c0_23 = arith.constant 0 : index
    %69 = vector.load %arg2[%c7, %c0_22, %c0_23] : memref<8x128x128xf32, #tpu.memory_space<vmem>>, vector<1x128x128xf32>
    %70 = vector.shape_cast %69 : vector<1x128x128xf32> to vector<128x128xf32>
    %cst_24 = arith.constant dense<0.000000e+00> : vector<8x128xf32>
    %71 = tpu.matmul %68, %70, %cst_24 {dimension_numbers = #tpu.dot_dimension_numbers<[1], [0], [0], [1], [0, 0, 1, 1], [], []>} : vector<8x128xf32>, vector<128x128xf32>, vector<8x128xf32> -> vector<8x128xf32>
    %72 = arith.addf %63, %71 : vector<8x128xf32>
    %c0_25 = arith.constant 0 : index
    %c0_26 = arith.constant 0 : index
    %73 = vector.load %arg3[%c0_25, %c0_26] : memref<8x128xf32, #tpu.memory_space<vmem>>, vector<8x128xf32>
    tpu.vector_store %arg3[%c0_25, %c0_26], %72 {strides = array<i32>} : memref<8x128xf32, #tpu.memory_space<vmem>>, vector<8x128xf32>,
    return
  }
  func.func @transform_0(%arg0: i32) -> (i32, i32) {
    %c0_i32 = arith.constant 0 : i32
    %c0_i32_0 = arith.constant 0 : i32
    return %arg0, %c0_i32 : i32, i32
  }
  func.func @transform_1(%arg0: i32) -> (i32, i32, i32) {
    %c0_i32 = arith.constant 0 : i32
    %c0_i32_0 = arith.constant 0 : i32
    %c0_i32_1 = arith.constant 0 : i32
    %c0_i32_2 = arith.constant 0 : i32
    return %c0_i32, %c0_i32_0, %c0_i32_1 : i32, i32, i32
  }
  func.func @transform_2(%arg0: i32) -> (i32, i32) {
    %c0_i32 = arith.constant 0 : i32
    %c0_i32_0 = arith.constant 0 : i32
    return %arg0, %c0_i32 : i32, i32
  }
}

</mosaic_0001>

<bundles_post_ra>
// kernel: tpu_custom_call.1
= control target key start
LH: loop header
LB: loop body
LE: loop exit
PB: predicated region body
PF: predicated region fallthrough
CT: control target
= control target key end

     0   :  { %7 = vsyncpa [#allocation3], 0  ;;  %s580_s0 = inlined_call_operand.hbm [shape: s32[8,8], index: 0, kind: input, shape index: {}]   ;;  %s581_s1 = inlined_call_operand.hbm [shape: f32[8,128,128], index: 1, kind: input, shape index: {}]   ;;  %s582_s2 = inlined_call_operand.hbm [shape: f32[8,128], index: 2, kind: output, shape index: {}]  }
   0x1   :  { %8 = vsyncpa [#allocation6], 0 }
   0x2   :  { %9 = vsyncpa [#allocation4], 0  ;;  %s15_s11 = sshll.u32 %s580_s0, 4  ;;  %s530_s12 = smov [#allocation2]   ;;  %s16_s11 = int_to_ptr.hbm [resolvable:$true] %s15_s11 }
   0x3   :  { %s17_s13 = sshll.u32 %s530_s12, 4  ;;  %s25_s16 = sshll.u32 %s581_s1, 4  ;;  %s18_s13 = int_to_ptr.vmem [resolvable:$true] %s17_s13  ;;  %s26_s16 = int_to_ptr.hbm [resolvable:$true] %s25_s16 }
   0x4   :  { %20 = dma.hbm_to_vmem [thread:$0]  %s16_s11, 128, %s18_s13, [#allocation3]  }
   0x5   :  { %s531_s17 = smov [#allocation5]   ;;  %s532_s19 = smov 128  }
   0x6   :  { %s27_s18 = sshll.u32 %s531_s17, 4  ;;  %s533_s20 = smov 8   ;;  %s28_s18 = int_to_ptr.vmem [resolvable:$true] %s27_s18 }
   0x7   :  { %33 = dma.hbm_to_vmem [thread:$0]  %s26_s16, 16384, %s28_s18, [#allocation6], %s532_s19, %s532_s19, %s533_s20  }
   0x8   :  { %524 = dma.done.wait [#allocation3], 128  }
   0x9   :  { %525 = vsyncadd [#allocation3], 4294967168 }
   0xa   :  { %526 = dma.done.wait [#allocation6], 16384  }
   0xb   :  { %527 = vsyncadd [#allocation6], 4294950912  ;;  %v534_v0 = vmov 3   ;;  %v535_v1 = vmov 2   ;;  %v536_v2 = vmov 6   ;;  %v565_v3 = vld [vmem:[#allocation2] sm:$0xff] }
   0xc   :  { %445 = vset.pattern.permute.xlu1 %v534_v0  ;;  %443 = vset.pattern.permute.xlu0 %v535_v1  ;;  %v152_v4 = vld [vmem:[#allocation5 + $0x178] sm:$0xff]  ;;  %v151_v5 = vld [vmem:[#allocation5 + $0x170] sm:$0xff]  ;;  %v150_v8 = vld [vmem:[#allocation5 + $0x168] sm:$0xff]  ;;  %v537_v18 = vmov 0   ;;  %v538_v19 = vmov 1   ;;  %v539_v23 = vmov 4  }
   0xd   :  { %447 = vset.pattern.permute.xlu2 %v536_v2  ;;  %175 = vperm.xlu1 %445, %v565_v3   ;;  %v89_v6 = vld [vmem:[#allocation5 + $0xf8] sm:$0xff]  ;;  %v88_v9 = vld [vmem:[#allocation5 + $0xf0] sm:$0xff]  ;;  %v87_v12 = vld [vmem:[#allocation5 + $0xe8] sm:$0xff]  ;;  %v540_v35 = vmov 7   ;;  %v541_v39 = vmov 5   ;;  %s543_s0 = smov [#allocation7]  }
   0xe   :  { %131 = vperm.xlu0 %443, %v565_v3   ;;  %307 = vperm.xlu2 %447, %v565_v3   ;;  %v196_v7 = vld [vmem:[#allocation5 + $0x1f8] sm:$0xff]  ;;  %v195_v11 = vld [vmem:[#allocation5 + $0x1f0] sm:$0xff]  ;;  %v149_v14 = vld [vmem:[#allocation5 + $0x160] sm:$0xff]  ;;  %s400_s1 = sshll.u32 %s543_s0, 4  ;;  %s402_s23 = sshll.u32 %s582_s2, 4  ;;  %s401_s1 = int_to_ptr.vmem [resolvable:$true] %s400_s1  ;;  %s403_s23 = int_to_ptr.hbm [resolvable:$true] %s402_s23 }
   0xf   :  { %153 = vmatpush.msra.mxu2 %v152_v4  ;;  %90 = vmatpush.msra.mxu0 %v89_v6  ;;  %v66_v10 = vld [vmem:[#allocation5 + $0x78] sm:$0xff]  ;;  %v65_v13 = vld [vmem:[#allocation5 + $0x70] sm:$0xff]  ;;  %v194_v15 = vld [vmem:[#allocation5 + $0x1e8] sm:$0xff] }
  0x10   :  { %197 = vmatpush.msra.mxu3 %v196_v7  ;;  %110 = vmatpush.msra.mxu1 %v66_v10  ;;  %v64_v16 = vld [vmem:[#allocation5 + $0x68] sm:$0xff]  ;;  %v148_v17 = vld [vmem:[#allocation5 + $0x158] sm:$0xff]  ;;  %v86_v20 = vld [vmem:[#allocation5 + $0xe0] sm:$0xff] }
  0x11   :  { %154 = vmatpush.msra.mxu2 %v151_v5  ;;  %91 = vmatpush.msra.mxu0 %v88_v9  ;;  %v147_v21 = vld [vmem:[#allocation5 + $0x150] sm:$0xff]  ;;  %v193_v22 = vld [vmem:[#allocation5 + $0x1e0] sm:$0xff]  ;;  %v85_v24 = vld [vmem:[#allocation5 + $0xd8] sm:$0xff] }
  0x12   :  { %198 = vmatpush.msra.mxu3 %v195_v11  ;;  %111 = vmatpush.msra.mxu1 %v65_v13  ;;  %v63_v25 = vld [vmem:[#allocation5 + $0x60] sm:$0xff]  ;;  %v146_v26 = vld [vmem:[#allocation5 + $0x148] sm:$0xff]  ;;  %v192_v27 = vld [vmem:[#allocation5 + $0x1d8] sm:$0xff] }
  0x13   :  { %155 = vmatpush.msra.mxu2 %v150_v8  ;;  %92 = vmatpush.msra.mxu0 %v87_v12  ;;  %v84_v28 = vld [vmem:[#allocation5 + $0xd0] sm:$0xff]  ;;  %v62_v29 = vld [vmem:[#allocation5 + $0x58] sm:$0xff]  ;;  %v145_v30 = vld [vmem:[#allocation5 + $0x140] sm:$0xff] }
  0x14   :  { %199 = vmatpush.msra.mxu3 %v194_v15  ;;  %112 = vmatpush.msra.mxu1 %v64_v16  ;;  %v191_v31 = vld [vmem:[#allocation5 + $0x1d0] sm:$0xff]  ;;  %v83_v32 = vld [vmem:[#allocation5 + $0xc8] sm:$0xff]  ;;  %v144_v33 = vld [vmem:[#allocation5 + $0x138] sm:$0xff] }
  0x15   :  { %156 = vmatpush.msra.mxu2 %v149_v14  ;;  %446 = vset.pattern.permute.xlu1 %v537_v18  ;;  %v61_v34 = vld [vmem:[#allocation5 + $0x50] sm:$0xff]  ;;  %v190_v37 = vld [vmem:[#allocation5 + $0x1c8] sm:$0xff]  ;;  %v82_v38 = vld [vmem:[#allocation5 + $0xc0] sm:$0xff] }
  0x16   :  { %444 = vset.pattern.permute.xlu0 %v538_v19  ;;  %46 = vperm.xlu1 %446, %v565_v3   ;;  %v143_v36 = vld [vmem:[#allocation5 + $0x130] sm:$0xff]  ;;  %v142_v40 = vld [vmem:[#allocation5 + $0x128] sm:$0xff]  ;;  %v189_v42 = vld [vmem:[#allocation5 + $0x1c0] sm:$0xff] }
  0x17   :  { %68 = vperm.xlu0 %444, %v565_v3   ;;  %448 = vset.pattern.permute.xlu2 %v539_v23  ;;  %v60_v41 = vld [vmem:[#allocation5 + $0x48] sm:$0xff]  ;;  %v81_v43 = vld [vmem:[#allocation5 + $0xb8] sm:$0xff]  ;;  %v141_v44 = vld [vmem:[#allocation5 + $0x120] sm:$0xff] }
  0x18   :  { %157 = vmatpush.msra.mxu2 %v148_v17  ;;  %219 = vperm.xlu2 %448, %v565_v3   ;;  %v59_v45 = vld [vmem:[#allocation5 + $0x40] sm:$0xff]  ;;  %v188_v46 = vld [vmem:[#allocation5 + $0x1b8] sm:$0xff]  ;;  %v80_v47 = vld [vmem:[#allocation5 + $0xb0] sm:$0xff] }
  0x19   :  { %93 = vmatpush.msra.mxu0 %v86_v20  ;;  %200 = vmatpush.msra.mxu3 %v193_v22  ;;  %v140_v48 = vld [vmem:[#allocation5 + $0x118] sm:$0xff]  ;;  %v187_v50 = vld [vmem:[#allocation5 + $0x1b0] sm:$0xff]  ;;  %v79_v51 = vld [vmem:[#allocation5 + $0xa8] sm:$0xff] }
  0x1a   :  { %158 = vmatpush.msra.mxu2 %v147_v21  ;;  %113 = vmatpush.msra.mxu1 %v63_v25  ;;  %v58_v49 = vld [vmem:[#allocation5 + $0x38] sm:$0xff]  ;;  %v139_v52 = vld [vmem:[#allocation5 + $0x110] sm:$0xff]  ;;  %v186_v54 = vld [vmem:[#allocation5 + $0x1a8] sm:$0xff] }
  0x1b   :  { %94 = vmatpush.msra.mxu0 %v85_v24  ;;  %201 = vmatpush.msra.mxu3 %v192_v27  ;;  %v57_v53 = vld [vmem:[#allocation5 + $0x30] sm:$0xff]  ;;  %v78_v55 = vld [vmem:[#allocation5 + $0xa0] sm:$0xff]  ;;  %v138_v56 = vld [vmem:[#allocation5 + $0x108] sm:$0xff] }
  0x1c   :  { %159 = vmatpush.msra.mxu2 %v146_v26  ;;  %114 = vmatpush.msra.mxu1 %v62_v29  ;;  %v56_v57 = vld [vmem:[#allocation5 + $0x28] sm:$0xff]  ;;  %v185_v58 = vld [vmem:[#allocation5 + $0x1a0] sm:$0xff]  ;;  %v77_v59 = vld [vmem:[#allocation5 + $0x98] sm:$0xff] }
  0x1d   :  { %95 = vmatpush.msra.mxu0 %v84_v28  ;;  %202 = vmatpush.msra.mxu3 %v191_v31  ;;  %v137_v60 = vld [vmem:[#allocation5 + $0x100] sm:$0xff]  ;;  %v328_v62 = vld [vmem:[#allocation5 + $0x378] sm:$0xff]  ;;  %v76_v0 = vld [vmem:[#allocation5 + $0x90] sm:$0xff] }
  0x1e   :  { %160 = vmatpush.msra.mxu2 %v145_v30  ;;  %449 = vset.pattern.permute.xlu1 %v540_v35  ;;  %v55_v61 = vld [vmem:[#allocation5 + $0x20] sm:$0xff]  ;;  %v184_v63 = vld [vmem:[#allocation5 + $0x198] sm:$0xff]  ;;  %v327_v2 = vld [vmem:[#allocation5 + $0x370] sm:$0xff] }
  0x1f   :  { %96 = vmatpush.msra.mxu0 %v83_v32  ;;  %351 = vperm.xlu1 %449, %v565_v3   ;;  %v54_v1 = vld [vmem:[#allocation5 + $0x18] sm:$0xff]  ;;  %v75_v4 = vld [vmem:[#allocation5 + $0x88] sm:$0xff]  ;;  %v53_v5 = vld [vmem:[#allocation5 + $0x10] sm:$0xff] }
  0x20   :  { %161 = vmatpush.msra.mxu2 %v144_v33  ;;  %450 = vset.pattern.permute.xlu2 %v541_v39  ;;  %v326_v6 = vld [vmem:[#allocation5 + $0x368] sm:$0xff]  ;;  %v74_v8 = vld [vmem:[#allocation5 + $0x80] sm:$0xff]  ;;  %v240_v12 = vld [vmem:[#allocation5 + $0x278] sm:$0xff] }
  0x21   :  { %115 = vmatpush.msra.mxu1 %v61_v34  ;;  %263 = vperm.xlu2 %450, %v565_v3   ;;  %v183_v3 = vld [vmem:[#allocation5 + $0x190] sm:$0xff]  ;;  %v182_v7 = vld [vmem:[#allocation5 + $0x188] sm:$0xff]  ;;  %v325_v10 = vld [vmem:[#allocation5 + $0x360] sm:$0xff] }
  0x22   :  { %162 = vmatpush.msra.mxu2 %v143_v36  ;;  %203 = vmatpush.msra.mxu3 %v190_v37  ;;  %v52_v9 = vld [vmem:[#allocation5 + $0x8] sm:$0xff]  ;;  %v181_v11 = vld [vmem:[#allocation5 + $0x180] sm:$0xff]  ;;  %v324_v14 = vld [vmem:[#allocation5 + $0x358] sm:$0xff] }
  0x23   :  { %97 = vmatpush.msra.mxu0 %v82_v38  ;;  %116 = vmatpush.msra.mxu1 %v60_v41  ;;  %v51_v13 = vld [vmem:[#allocation5] sm:$0xff]  ;;  %v372_v15 = vld [vmem:[#allocation5 + $0x3f8] sm:$0xff]  ;;  %v239_v16 = vld [vmem:[#allocation5 + $0x270] sm:$0xff] }
  0x24   :  { %163 = vmatpush.msra.mxu2 %v142_v40  ;;  %204 = vmatpush.msra.mxu3 %v189_v42  ;;  %v284_v17 = vld [vmem:[#allocation5 + $0x2f8] sm:$0xff]  ;;  %v323_v18 = vld [vmem:[#allocation5 + $0x350] sm:$0xff]  ;;  %v238_v20 = vld [vmem:[#allocation5 + $0x268] sm:$0xff] }
  0x25   :  { %98 = vmatpush.msra.mxu0 %v81_v43  ;;  %117 = vmatpush.msra.mxu1 %v59_v45  ;;  %v371_v19 = vld [vmem:[#allocation5 + $0x3f0] sm:$0xff]  ;;  %v322_v22 = vld [vmem:[#allocation5 + $0x348] sm:$0xff]  ;;  %v237_v24 = vld [vmem:[#allocation5 + $0x260] sm:$0xff] }
  0x26   :  { %164 = vmatpush.msra.mxu2 %v141_v44  ;;  %205 = vmatpush.msra.mxu3 %v188_v46  ;;  %v283_v21 = vld [vmem:[#allocation5 + $0x2f0] sm:$0xff]  ;;  %v370_v23 = vld [vmem:[#allocation5 + $0x3e8] sm:$0xff]  ;;  %v321_v26 = vld [vmem:[#allocation5 + $0x340] sm:$0xff] }
  0x27   :  { %99 = vmatpush.msra.mxu0 %v80_v47  ;;  %118 = vmatpush.msra.mxu1 %v58_v49  ;;  %v282_v25 = vld [vmem:[#allocation5 + $0x2e8] sm:$0xff]  ;;  %v369_v27 = vld [vmem:[#allocation5 + $0x3e0] sm:$0xff]  ;;  %v236_v28 = vld [vmem:[#allocation5 + $0x258] sm:$0xff] }
  0x28   :  { %165 = vmatpush.msra.mxu2 %v140_v48  ;;  %206 = vmatpush.msra.mxu3 %v187_v50  ;;  %v281_v29 = vld [vmem:[#allocation5 + $0x2e0] sm:$0xff]  ;;  %v320_v30 = vld [vmem:[#allocation5 + $0x338] sm:$0xff]  ;;  %v235_v32 = vld [vmem:[#allocation5 + $0x250] sm:$0xff] }
  0x29   :  { %100 = vmatpush.msra.mxu0 %v79_v51  ;;  %119 = vmatpush.msra.mxu1 %v57_v53  ;;  %v368_v31 = vld [vmem:[#allocation5 + $0x3d8] sm:$0xff]  ;;  %v319_v34 = vld [vmem:[#allocation5 + $0x330] sm:$0xff]  ;;  %v234_v37 = vld [vmem:[#allocation5 + $0x248] sm:$0xff] }
  0x2a   :  { %166 = vmatpush.msra.mxu2 %v139_v52  ;;  %207 = vmatpush.msra.mxu3 %v186_v54  ;;  %v280_v33 = vld [vmem:[#allocation5 + $0x2d8] sm:$0xff]  ;;  %v367_v36 = vld [vmem:[#allocation5 + $0x3d0] sm:$0xff]  ;;  %v318_v39 = vld [vmem:[#allocation5 + $0x328] sm:$0xff] }
  0x2b   :  { %101 = vmatpush.msra.mxu0 %v78_v55  ;;  %120 = vmatpush.msra.mxu1 %v56_v57  ;;  %v279_v38 = vld [vmem:[#allocation5 + $0x2d0] sm:$0xff]  ;;  %v317_v40 = vld [vmem:[#allocation5 + $0x320] sm:$0xff]  ;;  %v366_v41 = vld [vmem:[#allocation5 + $0x3c8] sm:$0xff] }
  0x2c   :  { %167 = vmatpush.msra.mxu2 %v138_v56  ;;  %208 = vmatpush.msra.mxu3 %v185_v58  ;;  %v233_v42 = vld [vmem:[#allocation5 + $0x240] sm:$0xff]  ;;  %v278_v43 = vld [vmem:[#allocation5 + $0x2c8] sm:$0xff]  ;;  %v316_v44 = vld [vmem:[#allocation5 + $0x318] sm:$0xff] }
  0x2d   :  { %102 = vmatpush.msra.mxu0 %v77_v59  ;;  %121 = vmatpush.msra.mxu1 %v55_v61  ;;  %v365_v45 = vld [vmem:[#allocation5 + $0x3c0] sm:$0xff]  ;;  %v232_v46 = vld [vmem:[#allocation5 + $0x238] sm:$0xff]  ;;  %v315_v48 = vld [vmem:[#allocation5 + $0x310] sm:$0xff] }
  0x2e   :  { %168 = vmatpush.msra.mxu2 %v137_v60  ;;  %209 = vmatpush.msra.mxu3 %v184_v63  ;;  %v277_v47 = vld [vmem:[#allocation5 + $0x2c0] sm:$0xff]  ;;  %v364_v49 = vld [vmem:[#allocation5 + $0x3b8] sm:$0xff]  ;;  %v231_v50 = vld [vmem:[#allocation5 + $0x230] sm:$0xff] }
  0x2f   :  { %103 = vmatpush.msra.mxu0 %v76_v0  ;;  %122 = vmatpush.msra.mxu1 %v54_v1  ;;  %v314_v51 = vld [vmem:[#allocation5 + $0x308] sm:$0xff]  ;;  %v363_v52 = vld [vmem:[#allocation5 + $0x3b0] sm:$0xff]  ;;  %v313_v55 = vld [vmem:[#allocation5 + $0x300] sm:$0xff] }
  0x30   :  { %329 = vmatpush.msrb.mxu2 %v328_v62  ;;  %210 = vmatpush.msra.mxu3 %v183_v3  ;;  %v230_v53 = vld [vmem:[#allocation5 + $0x228] sm:$0xff]  ;;  %v275_v54 = vld [vmem:[#allocation5 + $0x2b0] sm:$0xff]  ;;  %v229_v57 = vld [vmem:[#allocation5 + $0x220] sm:$0xff] }
  0x31   :  { %104 = vmatpush.msra.mxu0 %v75_v4  ;;  %123 = vmatpush.msra.mxu1 %v53_v5  ;;  %v362_v56 = vld [vmem:[#allocation5 + $0x3a8] sm:$0xff]  ;;  %v361_v59 = vld [vmem:[#allocation5 + $0x3a0] sm:$0xff]  ;;  %v228_v60 = vld [vmem:[#allocation5 + $0x218] sm:$0xff] }
  0x32   :  { %330 = vmatpush.msrb.mxu2 %v327_v2  ;;  %211 = vmatpush.msra.mxu3 %v182_v7  ;;  %v274_v58 = vld [vmem:[#allocation5 + $0x2a8] sm:$0xff]  ;;  %v273_v61 = vld [vmem:[#allocation5 + $0x2a0] sm:$0xff]  ;;  %v360_v62 = vld [vmem:[#allocation5 + $0x398] sm:$0xff] }
  0x33   :  { %105 = vmatpush.msra.mxu0 %v74_v8  ;;  %124 = vmatpush.msra.mxu1 %v52_v9  ;;  %v227_v63 = vld [vmem:[#allocation5 + $0x210] sm:$0xff]  ;;  %v272_v0 = vld [vmem:[#allocation5 + $0x298] sm:$0xff]  ;;  %v226_v2 = vld [vmem:[#allocation5 + $0x208] sm:$0xff]  ;;  %v43_v9 = vlaneseq }
  0x34   :  { %331 = vmatpush.msrb.mxu2 %v326_v6  ;;  %212 = vmatpush.msra.mxu3 %v181_v11  ;;  %v359_v1 = vld [vmem:[#allocation5 + $0x390] sm:$0xff]  ;;  %v358_v4 = vld [vmem:[#allocation5 + $0x388] sm:$0xff]  ;;  %v225_v5 = vld [vmem:[#allocation5 + $0x200] sm:$0xff] }
  0x35   :  { %241 = vmatpush.msrb.mxu0 %v240_v12  ;;  %125 = vmatpush.msra.mxu1 %v51_v13  ;;  %v271_v3 = vld [vmem:[#allocation5 + $0x290] sm:$0xff]  ;;  %v270_v6 = vld [vmem:[#allocation5 + $0x288] sm:$0xff]  ;;  %v357_v7 = vld [vmem:[#allocation5 + $0x380] sm:$0xff]  ;;  %v44_v11 = vand.u32 127, %v43_v9 }
  0x36   :  { %332 = vmatpush.msrb.mxu2 %v325_v10  ;;  %373 = vmatpush.msrb.mxu3 %v372_v15  ;;  %v269_v8 = vld [vmem:[#allocation5 + $0x280] sm:$0xff] }
  0x37   :  { %242 = vmatpush.msrb.mxu0 %v239_v16  ;;  %285 = vmatpush.msrb.mxu1 %v284_v17 }
  0x38   :  { %333 = vmatpush.msrb.mxu2 %v324_v14  ;;  %374 = vmatpush.msrb.mxu3 %v371_v19  ;;  %v542_v14 = vmov 1.0  }
  0x39   :  { %243 = vmatpush.msrb.mxu0 %v238_v20  ;;  %286 = vmatpush.msrb.mxu1 %v283_v21 }
  0x3a   :  { %334 = vmatpush.msrb.mxu2 %v323_v18  ;;  %375 = vmatpush.msrb.mxu3 %v370_v23 }
  0x3b   :  { %244 = vmatpush.msrb.mxu0 %v237_v24  ;;  %287 = vmatpush.msrb.mxu1 %v282_v25 }
  0x3c   :  { %335 = vmatpush.msrb.mxu2 %v322_v22  ;;  %376 = vmatpush.msrb.mxu3 %v369_v27 }
  0x3d   :  { %245 = vmatpush.msrb.mxu0 %v236_v28  ;;  %288 = vmatpush.msrb.mxu1 %v281_v29 }
  0x3e   :  { %336 = vmatpush.msrb.mxu2 %v321_v26  ;;  %377 = vmatpush.msrb.mxu3 %v368_v31 }
  0x3f   :  { %246 = vmatpush.msrb.mxu0 %v235_v32  ;;  %289 = vmatpush.msrb.mxu1 %v280_v33 }
  0x40   :  { %337 = vmatpush.msrb.mxu2 %v320_v30  ;;  %378 = vmatpush.msrb.mxu3 %v367_v36 }
  0x41   :  { %247 = vmatpush.msrb.mxu0 %v234_v37  ;;  %290 = vmatpush.msrb.mxu1 %v279_v38 }
  0x42   :  { %338 = vmatpush.msrb.mxu2 %v319_v34  ;;  %451 = vset.pattern.permute.xlu0 %v540_v35  ;;  %v276_v35 = vld [vmem:[#allocation5 + $0x2b8] sm:$0xff] }
  0x43   :  { %379 = vmatpush.msrb.mxu3 %v366_v41  ;;  %248 = vmatpush.msrb.mxu0 %v233_v42 }
  0x44   :  { %339 = vmatpush.msrb.mxu2 %v318_v39  ;;  %291 = vmatpush.msrb.mxu1 %v278_v43 }
  0x45   :  { %380 = vmatpush.msrb.mxu3 %v365_v45  ;;  %249 = vmatpush.msrb.mxu0 %v232_v46 }
  0x46   :  { %340 = vmatpush.msrb.mxu2 %v317_v40  ;;  %292 = vmatpush.msrb.mxu1 %v277_v47 }
  0x47   :  { %381 = vmatpush.msrb.mxu3 %v364_v49  ;;  %250 = vmatpush.msrb.mxu0 %v231_v50 }
  0x48   :  { %341 = vmatpush.msrb.mxu2 %v316_v44  ;;  %293 = vmatpush.msrb.mxu1 %v276_v35 }
  0x49   :  { %382 = vmatpush.msrb.mxu3 %v363_v52  ;;  %251 = vmatpush.msrb.mxu0 %v230_v53 }
  0x4a   :  { %342 = vmatpush.msrb.mxu2 %v315_v48  ;;  %294 = vmatpush.msrb.mxu1 %v275_v54 }
  0x4b   :  { %383 = vmatpush.msrb.mxu3 %v362_v56  ;;  %252 = vmatpush.msrb.mxu0 %v229_v57 }
  0x4c   :  { %343 = vmatpush.msrb.mxu2 %v314_v51  ;;  %295 = vmatpush.msrb.mxu1 %v274_v58 }
  0x4d   :  { %384 = vmatpush.msrb.mxu3 %v361_v59  ;;  %253 = vmatpush.msrb.mxu0 %v228_v60 }
  0x4e   :  { %344 = vmatpush.msrb.mxu2 %v313_v55  ;;  %296 = vmatpush.msrb.mxu1 %v273_v61 }
  0x4f   :  { %385 = vmatpush.msrb.mxu3 %v360_v62  ;;  %254 = vmatpush.msrb.mxu0 %v227_v63 }
  0x50   :  { %297 = vmatpush.msrb.mxu1 %v272_v0 }
  0x51   :  { %386 = vmatpush.msrb.mxu3 %v359_v1  ;;  %255 = vmatpush.msrb.mxu0 %v226_v2 }
  0x52   :  { %298 = vmatpush.msrb.mxu1 %v271_v3 }
  0x53   :  { %387 = vmatpush.msrb.mxu3 %v358_v4  ;;  %256 = vmatpush.msrb.mxu0 %v225_v5 }
  0x54   :  { %299 = vmatpush.msrb.mxu1 %v270_v6 }
  0x55   :  { %388 = vmatpush.msrb.mxu3 %v357_v7 }
  0x56   :  { %300 = vmatpush.msrb.mxu1 %v269_v8 }
  0x68   :  { %v308_v10 = vpop.permute.xlu2 %307 }
  0x69   :  { %vm309_vm2 = vcmp.eq.s32.totalorder %v44_v11, %v308_v10 }
  0x72   :  { %v220_v15 = vpop.permute.xlu2 %219 }
  0x73   :  { %vm221_vm6 = vcmp.eq.s32.totalorder %v44_v11, %v220_v15 }
  0x7b   :  { %v264_v18 = vpop.permute.xlu2 %263 }
  0x7c   :  { %vm265_vm5 = vcmp.eq.s32.totalorder %v44_v11, %v264_v18 }
  0x7f   :  { %v176_v12 = vpop.permute.xlu1 %175 }
  0x80   :  { %v132_v13 = vpop.permute.xlu0 %131  ;;  %vm177_vm0 = vcmp.eq.s32.totalorder %v44_v11, %v176_v12 }
  0x81   :  { %vm133_vm1 = vcmp.eq.s32.totalorder %v44_v11, %v132_v13  ;;  %420 = vmatmul.msk.f32.vlgmr.msra.gmra.mxu3 %vm177_vm0, %v542_v14 }
  0x82   :  { %418 = vmatmul.msk.f32.vlgmr.msra.gmra.mxu2 %vm133_vm1, %v542_v14 }
  0x88   :  { %v47_v16 = vpop.permute.xlu1 %46 }
  0x89   :  { %v69_v17 = vpop.permute.xlu0 %68  ;;  %vm48_vm3 = vcmp.eq.s32.totalorder %v44_v11, %v47_v16 }
  0x8a   :  { %vm70_vm4 = vcmp.eq.s32.totalorder %v44_v11, %v69_v17  ;;  %426 = vmatmul.msk.f32.vlgmr.msrb.gmra.mxu2 %vm309_vm2, %v542_v14  ;;  %416 = vmatmul.msk.f32.vlgmr.msra.gmra.mxu1 %vm48_vm3, %v542_v14 }
  0x8b   :  { %415 = vmatmul.msk.f32.vlgmr.msra.gmra.mxu0 %vm70_vm4, %v542_v14 }
  0x91   :  { %v352_v19 = vpop.permute.xlu1 %351 }
  0x92   :  { %vm353_vm7 = vcmp.eq.s32.totalorder %v44_v11, %v352_v19  ;;  %424 = vmatmul.msk.f32.vlgmr.msrb.gmra.mxu1 %vm265_vm5, %v542_v14 }
  0x93   :  { %422 = vmatmul.msk.f32.vlgmr.msrb.gmra.mxu0 %vm221_vm6, %v542_v14  ;;  %428 = vmatmul.msk.f32.vlgmr.msrb.gmra.mxu3 %vm353_vm7, %v542_v14 }
 0x104   :  { %v214_v25 = vpop.f32.mrf.mxu3 }
 0x105   :  { %v170_v23 = vpop.f32.mrf.mxu2 }
 0x107   :  { %v127_v21 = vpop.f32.mrf.mxu1 }
 0x108   :  { %v107_v20 = vpop.f32.mrf.mxu0 }
 0x109   :  { %v128_v22 = vadd.f32 %v127_v21, %v107_v20 }
 0x10b   :  { %v173_v24 = vadd.f32 %v170_v23, %v128_v22 }
 0x10d   :  { %v217_v26 = vadd.f32 %v214_v25, %v173_v24  ;;  %v346_v31 = vpop.f32.mrf.mxu2 }
 0x10f   :  { %v302_v28 = vpop.f32.mrf.mxu1 }
 0x110   :  { %v258_v27 = vpop.f32.mrf.mxu0 }
 0x111   :  { %v261_v29 = vadd.f32 %v258_v27, %v217_v26 }
 0x113   :  { %v305_v30 = vadd.f32 %v302_v28, %v261_v29 }
 0x115   :  { %v349_v32 = vadd.f32 %v346_v31, %v305_v30 }
 0x116   :  { %v390_v33 = vpop.f32.mrf.mxu3 }
 0x117   :  { %v393_v34 = vadd.f32 %v390_v33, %v349_v32 }
 0x119   :  { %394 = vst [vmem:[#allocation7] sm:$0xff] %v393_v34 }
 0x11a   :  { %405 = dma.vmem_to_hbm [thread:$0]  %s401_s1, 128, %s403_s23, [#allocation4]  }
 0x11b   :  { %528 = dma.done.wait [#allocation4], 128  }
 0x11c   :  { %529 = vsyncadd [#allocation4], 4294967168 }
 0x11d   :  { %410 = vsyncpa [#allocation3], 1 }
 0x11e   :  { %411 = vsyncpa [#allocation6], 1 }
 0x11f   :  { %412 = vsyncpa [#allocation4], 1 }

</bundles_post_ra>
